<compile_context>
chip_gen: v7x
topology: tpu7x:2x2x1
jax: 0.10.0
libtpu: 0.0.40
codegen_flags: <defaults>
</compile_context>

<pallas_src>
import functools

import jax
import jax.numpy as jnp
from jax.experimental import pallas as pl
from jax.experimental.pallas import tpu as pltpu

LANE = 128
MIB = 1024 * 1024


def _round_up(n, m):
    return ((n + m - 1) // m) * m


def _device_kind():
    try:
        return jax.devices()[0].device_kind.lower()
    except Exception:
        return ""


# --------------------------------------------------------------------------- #
# Kernel
# --------------------------------------------------------------------------- #
def late_fusion_kernel(
    x1_ref, x2_ref,
    we1_ref, be1_ref,          # embedding1: in1 -> H
    we2_ref, be2_ref,          # embedding2: in2 -> in2
    wu1_ref, bu1_ref,          # unet1: in2 -> H
    wu2_ref, bu2_ref,          # unet2: H -> H
    wu3_ref, bu3_ref,          # unet3: H -> H
    wf1a_ref,                  # fc1 rows acting on h1 (top half), K=Hp
    wf1b_ref, bf1_ref,         # fc1 rows acting on h2 (bottom half) + bias
    wf2_ref, bf2_ref,          # fc2: H -> out (bias kept f32)
    o_ref,
    *, compute_dtype, epilogue_dtype,
):
    f32 = jnp.float32

    def layer(x, w_ref, b_ref):
        # MXU matmul with f32 accumulation; bias-add + ReLU epilogue in
        # epilogue_dtype (bf16 on v6e/v7x halves VPU work, f32 on v5e).
        acc = jnp.dot(x, w_ref[...], preferred_element_type=f32)
        y = jnp.maximum(acc.astype(epilogue_dtype) + b_ref[...], 0)
        return y.astype(compute_dtype)

    # Branch 1: embedding1 + relu.  h1 is consumed immediately by the first
    # half of fc1 -> no concat copy, no long live range across branch 2.
    h1 = layer(x1_ref[...], we1_ref, be1_ref)
    acc = jnp.dot(h1, wf1a_ref[...], preferred_element_type=f32)

    # Branch 2: embedding2 -> unet1 -> unet2 -> unet3, each with relu.
    h2 = layer(x2_ref[...], we2_ref, be2_ref)
    h2 = layer(h2, wu1_ref, bu1_ref)
    h2 = layer(h2, wu2_ref, bu2_ref)
    h2 = layer(h2, wu3_ref, bu3_ref)

    # fc1 on torch.cat((h1, h2), dim=1) == h1 @ W_top + h2 @ W_bot (+ bias).
    acc = acc + jnp.dot(h2, wf1b_ref[...], preferred_element_type=f32)
    z = jnp.maximum(acc.astype(epilogue_dtype) + bf1_ref[...], 0)
    z = z.astype(compute_dtype)

    # fc2 + relu; final epilogue stays in f32, store is lane-dense.
    out = jnp.dot(z, wf2_ref[...], preferred_element_type=f32) + bf2_ref[...]
    o_ref[...] = jnp.maximum(out, 0).astype(o_ref.dtype)


# --------------------------------------------------------------------------- #
# Tuning helpers
# --------------------------------------------------------------------------- #
def _pick_epilogue_dtype(compute_dtype):
    kind = _device_kind()
    has_bf16_valu = ("v6" in kind) or ("v7" in kind)
    if jnp.dtype(compute_dtype) == jnp.dtype(jnp.bfloat16) and has_bf16_valu:
        return jnp.bfloat16
    return jnp.float32


def _pick_batch_tile(batch, compute_dtype):
    """Round the batch only to the sublane requirement for small batches
    (8 rows f32 / 16 rows bf16); 512-row tiles for large batches.  On v7x,
    halve the tile so the batch grid has >=2 steps for both TensorCores."""
    kind = _device_kind()
    sub = 8 if jnp.dtype(compute_dtype).itemsize >= 4 else 16
    native = 512
    b_round = _round_up(max(batch, 1), sub)
    if "v7" in kind:
        tb = _round_up(-(-b_round // 2), sub)
    else:
        tb = b_round
    return max(sub, min(native, tb))


def _vmem_limit_bytes(weights, tb, in1p, in2p, outp, compute_dtype, out_dtype):
    kind = _device_kind()
    wbytes = sum(int(w.size) * w.dtype.itemsize for w in weights)
    c_item = jnp.dtype(compute_dtype).itemsize
    o_item = jnp.dtype(out_dtype).itemsize
    # Budget: weights (allow the double-buffered fallback) + pipelined
    # activation tiles + headroom for Mosaic internal scratch.
    est = 2 * wbytes + 2 * tb * ((in1p + in2p) * c_item + outp * o_item) + 4 * MIB
    # v7x: 64 MiB physical per TC -> leave headroom.  v5e/v6e: 128 MiB.
    cap = 52 * MIB if "v7" in kind else 100 * MIB
    return int(min(cap, max(32 * MIB, est)))


# --------------------------------------------------------------------------- #
# Parameter preparation (runs once, hoisted out of the per-call path)
# --------------------------------------------------------------------------- #
def prepare_params(params, compute_dtype=jnp.bfloat16, epilogue_dtype=None):
    """Pad/cast every weight once.  Weights are stored [in, out]; all feature
    dims are zero-padded to lane multiples so every matmul operand and the
    output are (8,128)-tileable and stores are lane-dense.  fc1 is split into
    its two K=H row-halves so the kernel never materializes the concat."""
    if epilogue_dtype is None:
        epilogue_dtype = _pick_epilogue_dtype(compute_dtype)

    in1, H = params["we1"].shape
    in2 = params["we2"].shape[0]
    OUT = params["wf2"].shape[1]
    in1p, in2p, Hp, OUTp = (_round_up(d, LANE) for d in (in1, in2, H, OUT))

    def padw(w, r, c):
        return jnp.pad(w, ((0, r - w.shape[0]), (0, c - w.shape[1]))).astype(compute_dtype)

    def padb(b, c, dt):
        return jnp.pad(b, ((0, 0), (0, c - b.shape[1]))).astype(dt)

    wf1 = params["wf1"]
    weights = (
        padw(params["we1"], in1p, Hp), padb(params["be1"], Hp, epilogue_dtype),
        padw(params["we2"], in2p, in2p), padb(params["be2"], in2p, epilogue_dtype),
        padw(params["wu1"], in2p, Hp), padb(params["bu1"], Hp, epilogue_dtype),
        padw(params["wu2"], Hp, Hp), padb(params["bu2"], Hp, epilogue_dtype),
        padw(params["wu3"], Hp, Hp), padb(params["bu3"], Hp, epilogue_dtype),
        padw(wf1[:H], Hp, Hp),                      # fc1 half acting on h1
        padw(wf1[H:], Hp, Hp),                      # fc1 half acting on h2
        padb(params["bf1"], Hp, epilogue_dtype),
        padw(params["wf2"], Hp, OUTp),
        padb(params["bf2"], OUTp, jnp.float32),     # final epilogue stays f32
    )
    dims = (in1p, in2p, Hp, OUTp, OUT)
    return weights, dims, epilogue_dtype


# --------------------------------------------------------------------------- #
# Jitted forward
# --------------------------------------------------------------------------- #
@functools.partial(jax.jit, static_argnums=(3, 4, 5, 6, 7, 8))
def _forward(x1, x2, weights, dims, compute_dtype, epilogue_dtype, out_dtype,
             tb, tuned):
    in1p, in2p, Hp, OUTp, OUT = dims
    B = x1.shape[0]
    b_pad = _round_up(B, tb)
    kind = _device_kind()

    # Pad batch + feature dims (fuses with the pallas_call under jit).
    x1p = jnp.pad(x1, ((0, b_pad - B), (0, in1p - x1.shape[1]))).astype(compute_dtype)
    x2p = jnp.pad(x2, ((0, b_pad - B), (0, in2p - x2.shape[1]))).astype(compute_dtype)

    grid = (b_pad // tb,)
    in_depth = 3 if (tuned and "v5" in kind) else None   # deeper input buffering on v5e

    def act_spec(feat):
        if in_depth is not None:
            return pl.BlockSpec((tb, feat), lambda i: (i, 0),
                                pipeline_mode=pl.Buffered(in_depth))
        return pl.BlockSpec((tb, feat), lambda i: (i, 0))

    def weight_spec(shape):
        # Grid-invariant operand: constant index_map, so a second pipeline
        # buffer is pure VMEM waste -> request single buffering when tuned.
        if tuned:
            return pl.BlockSpec(shape, lambda i: (0, 0),
                                pipeline_mode=pl.Buffered(1))
        return pl.BlockSpec(shape, lambda i: (0, 0))

    flops = 2 * b_pad * (in1p * Hp + in2p * in2p + in2p * Hp
                         + 4 * Hp * Hp + Hp * OUTp)
    bytes_accessed = (int(x1p.size) * x1p.dtype.itemsize
                      + int(x2p.size) * x2p.dtype.itemsize
                      + sum(int(w.size) * w.dtype.itemsize for w in weights)
                      + b_pad * OUTp * jnp.dtype(out_dtype).itemsize)
    cost = pl.CostEstimate(flops=int(flops), transcendentals=0,
                           bytes_accessed=int(bytes_accessed))

    vmem_limit = _vmem_limit_bytes(weights, tb, in1p, in2p, OUTp,
                                   compute_dtype, out_dtype)

    kernel = functools.partial(late_fusion_kernel,
                               compute_dtype=compute_dtype,
                               epilogue_dtype=epilogue_dtype)

    out = pl.pallas_call(
        kernel,
        out_shape=jax.ShapeDtypeStruct((b_pad, OUTp), out_dtype),
        grid_spec=pl.GridSpec(
            grid=grid,
            in_specs=[act_spec(in1p), act_spec(in2p)]
                     + [weight_spec(w.shape) for w in weights],
            out_specs=pl.BlockSpec((tb, OUTp), lambda i: (i, 0)),
        ),
        compiler_params=pltpu.CompilerParams(
            dimension_semantics=("parallel",),
            vmem_limit_bytes=vmem_limit,
        ),
        cost_estimate=cost,
    )(x1p, x2p, *weights)

    return out[:B, :OUT]


def make_late_fusion(params, *, compute_dtype=jnp.bfloat16,
                     out_dtype=jnp.float32, batch_tile=None):
    """Return a jitted forward(x1, x2) for the LateFusion module.  Weight
    padding / casting / fc1 split is precomputed here once, so the per-call
    path is just the x1/x2 pads fused with the pallas_call."""
    weights, dims, epilogue_dtype = prepare_params(params, compute_dtype)
    state = {"tuned": True}

    def forward(x1, x2):
        tb = batch_tile if batch_tile is not None else _pick_batch_tile(
            x1.shape[0], compute_dtype)
        if state["tuned"]:
            try:
                return _forward(x1, x2, weights, dims, compute_dtype,
                                epilogue_dtype, out_dtype, tb, True)
            except (TypeError, ValueError, NotImplementedError,
                    pltpu.LoweringException):
                # pl.Buffered(...) is a pure pipelining hint; if this
                # JAX/Mosaic build rejects it, permanently fall back to the
                # default double-buffered specs.  Anything else (VMEM OOM,
                # shape bugs, runtime errors) propagates to the caller.
                state["tuned"] = False
        return _forward(x1, x2, weights, dims, compute_dtype,
                        epilogue_dtype, out_dtype, tb, False)

    return forward


# --------------------------------------------------------------------------- #
# Synthetic init + pure-JAX reference
# --------------------------------------------------------------------------- #
def init_params(key, in1, in2, hidden, out):
    """Synthetic init mirroring nn.Linear; weights stored [in, out], biases [1, out]."""
    def linear(k, fan_in, fan_out):
        kw, kb = jax.random.split(k)
        bound = 1.0 / jnp.sqrt(float(fan_in))
        w = jax.random.uniform(kw, (fan_in, fan_out), jnp.float32, -bound, bound)
        b = jax.random.uniform(kb, (1, fan_out), jnp.float32, -bound, bound)
        return w, b

    keys = jax.random.split(key, 7)
    we1, be1 = linear(keys[0], in1, hidden)          # embedding1
    we2, be2 = linear(keys[1], in2, in2)             # embedding2
    wu1, bu1 = linear(keys[2], in2, hidden)          # unet1
    wu2, bu2 = linear(keys[3], hidden, hidden)       # unet2
    wu3, bu3 = linear(keys[4], hidden, hidden)       # unet3
    wf1, bf1 = linear(keys[5], 2 * hidden, hidden)   # fc1 (on concat)
    wf2, bf2 = linear(keys[6], hidden, out)          # fc2
    return {
        "we1": we1, "be1": be1, "we2": we2, "be2": be2,
        "wu1": wu1, "bu1": bu1, "wu2": wu2, "bu2": bu2,
        "wu3": wu3, "bu3": bu3, "wf1": wf1, "bf1": bf1,
        "wf2": wf2, "bf2": bf2,
    }


def reference_forward(x1, x2, p):
    """Pure-JAX f32 reference reproducing the PyTorch forward exactly."""
    r = lambda v: jnp.maximum(v, 0.0)
    h1 = r(x1 @ p["we1"] + p["be1"])
    h2 = r(x2 @ p["we2"] + p["be2"])
    h2 = r(h2 @ p["wu1"] + p["bu1"])
    h2 = r(h2 @ p["wu2"] + p["bu2"])
    h2 = r(h2 @ p["wu3"] + p["bu3"])
    z = jnp.concatenate([h1, h2], axis=1)
    z = r(z @ p["wf1"] + p["bf1"])
    z = r(z @ p["wf2"] + p["bf2"])
    return z


if __name__ == "__main__":
    # Small shapes consistent with the module (scaled-down in1/in2/hidden/out).
    B, IN1, IN2, HIDDEN, OUT = 2, 48, 16, 32, 48

    key = jax.random.PRNGKey(0)
    k1, k2, kp = jax.random.split(key, 3)
    x1 = jax.random.normal(k1, (B, IN1), jnp.float32)
    x2 = jax.random.normal(k2, (B, IN2), jnp.float32)
    params = init_params(kp, IN1, IN2, HIDDEN, OUT)

    ref = reference_forward(x1, x2, params)

    # Exact-path check (f32 matmul operands + f32 epilogue): tight tolerance.
    fwd_f32 = make_late_fusion(params, compute_dtype=jnp.float32)
    out_f32 = jax.block_until_ready(fwd_f32(x1, x2))
    assert out_f32.shape == (B, OUT)
    assert jnp.allclose(out_f32, ref, atol=2e-4, rtol=2e-4), "f32 kernel mismatch"

    # Fast path (bf16 matmul operands, f32 MXU accumulation): looser tolerance.
    fwd_bf16 = make_late_fusion(params)
    out_bf16 = jax.block_until_ready(fwd_bf16(x1, x2))
    assert out_bf16.shape == (B, OUT)
    rel_err = jnp.max(jnp.abs(out_bf16 - ref)) / (jnp.max(jnp.abs(ref)) + 1e-6)
    assert rel_err < 5e-2, f"bf16 kernel rel_err={float(rel_err)}"

    print("KERNEL_OK")
</pallas_src>

<mosaic_0001>
module attributes {stable_mosaic.version = 11 : i64} {
  func.func @late_fusion_kernel(%arg0: i32, %arg1: memref<8x128xf32, #tpu.memory_space<vmem>>, %arg2: memref<8x128xf32, #tpu.memory_space<vmem>>, %arg3: memref<128x128xf32, #tpu.memory_space<vmem>>, %arg4: memref<1x128xf32, #tpu.memory_space<vmem>>, %arg5: memref<128x128xf32, #tpu.memory_space<vmem>>, %arg6: memref<1x128xf32, #tpu.memory_space<vmem>>, %arg7: memref<128x128xf32, #tpu.memory_space<vmem>>, %arg8: memref<1x128xf32, #tpu.memory_space<vmem>>, %arg9: memref<128x128xf32, #tpu.memory_space<vmem>>, %arg10: memref<1x128xf32, #tpu.memory_space<vmem>>, %arg11: memref<128x128xf32, #tpu.memory_space<vmem>>, %arg12: memref<1x128xf32, #tpu.memory_space<vmem>>, %arg13: memref<128x128xf32, #tpu.memory_space<vmem>>, %arg14: memref<128x128xf32, #tpu.memory_space<vmem>>, %arg15: memref<1x128xf32, #tpu.memory_space<vmem>>, %arg16: memref<128x128xf32, #tpu.memory_space<vmem>>, %arg17: memref<1x128xf32, #tpu.memory_space<vmem>>, %arg18: memref<8x128xf32, #tpu.memory_space<vmem>>) attributes {dimension_semantics = [#tpu.dimension_semantics<parallel>], iteration_bounds = array<i64: 1>, scalar_prefetch = 0 : i64, scratch_operands = 0 : i64, tpu.core_type = #tpu.core_type<tc>, window_params = [{transform_indices = @transform_0, window_bounds = array<i64: 8, 128>}, {transform_indices = @transform_1, window_bounds = array<i64: 8, 128>}, {pipeline_mode = #tpu.pipeline_mode<synchronous>, transform_indices = @transform_2, window_bounds = array<i64: 128, 128>}, {pipeline_mode = #tpu.pipeline_mode<synchronous>, transform_indices = @transform_3, window_bounds = array<i64: 1, 128>}, {pipeline_mode = #tpu.pipeline_mode<synchronous>, transform_indices = @transform_4, window_bounds = array<i64: 128, 128>}, {pipeline_mode = #tpu.pipeline_mode<synchronous>, transform_indices = @transform_5, window_bounds = array<i64: 1, 128>}, {pipeline_mode = #tpu.pipeline_mode<synchronous>, transform_indices = @transform_6, window_bounds = array<i64: 128, 128>}, {pipeline_mode = #tpu.pipeline_mode<synchronous>, transform_indices = @transform_7, window_bounds = array<i64: 1, 128>}, {pipeline_mode = #tpu.pipeline_mode<synchronous>, transform_indices = @transform_8, window_bounds = array<i64: 128, 128>}, {pipeline_mode = #tpu.pipeline_mode<synchronous>, transform_indices = @transform_9, window_bounds = array<i64: 1, 128>}, {pipeline_mode = #tpu.pipeline_mode<synchronous>, transform_indices = @transform_10, window_bounds = array<i64: 128, 128>}, {pipeline_mode = #tpu.pipeline_mode<synchronous>, transform_indices = @transform_11, window_bounds = array<i64: 1, 128>}, {pipeline_mode = #tpu.pipeline_mode<synchronous>, transform_indices = @transform_12, window_bounds = array<i64: 128, 128>}, {pipeline_mode = #tpu.pipeline_mode<synchronous>, transform_indices = @transform_13, window_bounds = array<i64: 128, 128>}, {pipeline_mode = #tpu.pipeline_mode<synchronous>, transform_indices = @transform_14, window_bounds = array<i64: 1, 128>}, {pipeline_mode = #tpu.pipeline_mode<synchronous>, transform_indices = @transform_15, window_bounds = array<i64: 128, 128>}, {pipeline_mode = #tpu.pipeline_mode<synchronous>, transform_indices = @transform_16, window_bounds = array<i64: 1, 128>}, {transform_indices = @transform_17, window_bounds = array<i64: 8, 128>}]} {
    %c0 = arith.constant 0 : index
    %c0_0 = arith.constant 0 : index
    %0 = vector.load %arg1[%c0, %c0_0] : memref<8x128xf32, #tpu.memory_space<vmem>>, vector<8x128xf32>
    %c0_1 = arith.constant 0 : index
    %c0_2 = arith.constant 0 : index
    %1 = vector.load %arg3[%c0_1, %c0_2] : memref<128x128xf32, #tpu.memory_space<vmem>>, vector<128x128xf32>
    %cst = arith.constant dense<0.000000e+00> : vector<8x128xf32>
    %2 = tpu.matmul %0, %1, %cst {dimension_numbers = #tpu.dot_dimension_numbers<[1], [0], [0], [1], [0, 0, 1, 1], [], []>} : vector<8x128xf32>, vector<128x128xf32>, vector<8x128xf32> -> vector<8x128xf32>
    %c0_3 = arith.constant 0 : index
    %c0_4 = arith.constant 0 : index
    %3 = vector.load %arg4[%c0_3, %c0_4] : memref<1x128xf32, #tpu.memory_space<vmem>>, vector<1x128xf32>
    %4 = vector.broadcast %3 : vector<1x128xf32> to vector<8x128xf32>
    %5 = arith.addf %2, %4 : vector<8x128xf32>
    %cst_5 = arith.constant 0.000000e+00 : f32
    %6 = vector.broadcast %cst_5 : f32 to vector<8x128xf32>
    %7 = arith.maximumf %5, %6 : vector<8x128xf32>
    %c0_6 = arith.constant 0 : index
    %c0_7 = arith.constant 0 : index
    %8 = vector.load %arg13[%c0_6, %c0_7] : memref<128x128xf32, #tpu.memory_space<vmem>>, vector<128x128xf32>
    %cst_8 = arith.constant dense<0.000000e+00> : vector<8x128xf32>
    %9 = tpu.matmul %7, %8, %cst_8 {dimension_numbers = #tpu.dot_dimension_numbers<[1], [0], [0], [1], [0, 0, 1, 1], [], []>} : vector<8x128xf32>, vector<128x128xf32>, vector<8x128xf32> -> vector<8x128xf32>
    %c0_9 = arith.constant 0 : index
    %c0_10 = arith.constant 0 : index
    %10 = vector.load %arg2[%c0_9, %c0_10] : memref<8x128xf32, #tpu.memory_space<vmem>>, vector<8x128xf32>
    %c0_11 = arith.constant 0 : index
    %c0_12 = arith.constant 0 : index
    %11 = vector.load %arg5[%c0_11, %c0_12] : memref<128x128xf32, #tpu.memory_space<vmem>>, vector<128x128xf32>
    %cst_13 = arith.constant dense<0.000000e+00> : vector<8x128xf32>
    %12 = tpu.matmul %10, %11, %cst_13 {dimension_numbers = #tpu.dot_dimension_numbers<[1], [0], [0], [1], [0, 0, 1, 1], [], []>} : vector<8x128xf32>, vector<128x128xf32>, vector<8x128xf32> -> vector<8x128xf32>
    %c0_14 = arith.constant 0 : index
    %c0_15 = arith.constant 0 : index
    %13 = vector.load %arg6[%c0_14, %c0_15] : memref<1x128xf32, #tpu.memory_space<vmem>>, vector<1x128xf32>
    %14 = vector.broadcast %13 : vector<1x128xf32> to vector<8x128xf32>
    %15 = arith.addf %12, %14 : vector<8x128xf32>
    %cst_16 = arith.constant 0.000000e+00 : f32
    %16 = vector.broadcast %cst_16 : f32 to vector<8x128xf32>
    %17 = arith.maximumf %15, %16 : vector<8x128xf32>
    %c0_17 = arith.constant 0 : index
    %c0_18 = arith.constant 0 : index
    %18 = vector.load %arg7[%c0_17, %c0_18] : memref<128x128xf32, #tpu.memory_space<vmem>>, vector<128x128xf32>
    %cst_19 = arith.constant dense<0.000000e+00> : vector<8x128xf32>
    %19 = tpu.matmul %17, %18, %cst_19 {dimension_numbers = #tpu.dot_dimension_numbers<[1], [0], [0], [1], [0, 0, 1, 1], [], []>} : vector<8x128xf32>, vector<128x128xf32>, vector<8x128xf32> -> vector<8x128xf32>
    %c0_20 = arith.constant 0 : index
    %c0_21 = arith.constant 0 : index
    %20 = vector.load %arg8[%c0_20, %c0_21] : memref<1x128xf32, #tpu.memory_space<vmem>>, vector<1x128xf32>
    %21 = vector.broadcast %20 : vector<1x128xf32> to vector<8x128xf32>
    %22 = arith.addf %19, %21 : vector<8x128xf32>
    %cst_22 = arith.constant 0.000000e+00 : f32
    %23 = vector.broadcast %cst_22 : f32 to vector<8x128xf32>
    %24 = arith.maximumf %22, %23 : vector<8x128xf32>
    %c0_23 = arith.constant 0 : index
    %c0_24 = arith.constant 0 : index
    %25 = vector.load %arg9[%c0_23, %c0_24] : memref<128x128xf32, #tpu.memory_space<vmem>>, vector<128x128xf32>
    %cst_25 = arith.constant dense<0.000000e+00> : vector<8x128xf32>
    %26 = tpu.matmul %24, %25, %cst_25 {dimension_numbers = #tpu.dot_dimension_numbers<[1], [0], [0], [1], [0, 0, 1, 1], [], []>} : vector<8x128xf32>, vector<128x128xf32>, vector<8x128xf32> -> vector<8x128xf32>
    %c0_26 = arith.constant 0 : index
    %c0_27 = arith.constant 0 : index
    %27 = vector.load %arg10[%c0_26, %c0_27] : memref<1x128xf32, #tpu.memory_space<vmem>>, vector<1x128xf32>
    %28 = vector.broadcast %27 : vector<1x128xf32> to vector<8x128xf32>
    %29 = arith.addf %26, %28 : vector<8x128xf32>
    %cst_28 = arith.constant 0.000000e+00 : f32
    %30 = vector.broadcast %cst_28 : f32 to vector<8x128xf32>
    %31 = arith.maximumf %29, %30 : vector<8x128xf32>
    %c0_29 = arith.constant 0 : index
    %c0_30 = arith.constant 0 : index
    %32 = vector.load %arg11[%c0_29, %c0_30] : memref<128x128xf32, #tpu.memory_space<vmem>>, vector<128x128xf32>
    %cst_31 = arith.constant dense<0.000000e+00> : vector<8x128xf32>
    %33 = tpu.matmul %31, %32, %cst_31 {dimension_numbers = #tpu.dot_dimension_numbers<[1], [0], [0], [1], [0, 0, 1, 1], [], []>} : vector<8x128xf32>, vector<128x128xf32>, vector<8x128xf32> -> vector<8x128xf32>
    %c0_32 = arith.constant 0 : index
    %c0_33 = arith.constant 0 : index
    %34 = vector.load %arg12[%c0_32, %c0_33] : memref<1x128xf32, #tpu.memory_space<vmem>>, vector<1x128xf32>
    %35 = vector.broadcast %34 : vector<1x128xf32> to vector<8x128xf32>
    %36 = arith.addf %33, %35 : vector<8x128xf32>
    %cst_34 = arith.constant 0.000000e+00 : f32
    %37 = vector.broadcast %cst_34 : f32 to vector<8x128xf32>
    %38 = arith.maximumf %36, %37 : vector<8x128xf32>
    %c0_35 = arith.constant 0 : index
    %c0_36 = arith.constant 0 : index
    %39 = vector.load %arg14[%c0_35, %c0_36] : memref<128x128xf32, #tpu.memory_space<vmem>>, vector<128x128xf32>
    %cst_37 = arith.constant dense<0.000000e+00> : vector<8x128xf32>
    %40 = tpu.matmul %38, %39, %cst_37 {dimension_numbers = #tpu.dot_dimension_numbers<[1], [0], [0], [1], [0, 0, 1, 1], [], []>} : vector<8x128xf32>, vector<128x128xf32>, vector<8x128xf32> -> vector<8x128xf32>
    %41 = arith.addf %9, %40 : vector<8x128xf32>
    %c0_38 = arith.constant 0 : index
    %c0_39 = arith.constant 0 : index
    %42 = vector.load %arg15[%c0_38, %c0_39] : memref<1x128xf32, #tpu.memory_space<vmem>>, vector<1x128xf32>
    %43 = vector.broadcast %42 : vector<1x128xf32> to vector<8x128xf32>
    %44 = arith.addf %41, %43 : vector<8x128xf32>
    %cst_40 = arith.constant 0.000000e+00 : f32
    %45 = vector.broadcast %cst_40 : f32 to vector<8x128xf32>
    %46 = arith.maximumf %44, %45 : vector<8x128xf32>
    %c0_41 = arith.constant 0 : index
    %c0_42 = arith.constant 0 : index
    %47 = vector.load %arg16[%c0_41, %c0_42] : memref<128x128xf32, #tpu.memory_space<vmem>>, vector<128x128xf32>
    %cst_43 = arith.constant dense<0.000000e+00> : vector<8x128xf32>
    %48 = tpu.matmul %46, %47, %cst_43 {dimension_numbers = #tpu.dot_dimension_numbers<[1], [0], [0], [1], [0, 0, 1, 1], [], []>} : vector<8x128xf32>, vector<128x128xf32>, vector<8x128xf32> -> vector<8x128xf32>
    %c0_44 = arith.constant 0 : index
    %c0_45 = arith.constant 0 : index
    %49 = vector.load %arg17[%c0_44, %c0_45] : memref<1x128xf32, #tpu.memory_space<vmem>>, vector<1x128xf32>
    %50 = vector.broadcast %49 : vector<1x128xf32> to vector<8x128xf32>
    %51 = arith.addf %48, %50 : vector<8x128xf32>
    %cst_46 = arith.constant 0.000000e+00 : f32
    %52 = vector.broadcast %cst_46 : f32 to vector<8x128xf32>
    %53 = arith.maximumf %51, %52 : vector<8x128xf32>
    %c0_47 = arith.constant 0 : index
    %c0_48 = arith.constant 0 : index
    %54 = vector.load %arg18[%c0_47, %c0_48] : memref<8x128xf32, #tpu.memory_space<vmem>>, vector<8x128xf32>
    tpu.vector_store %arg18[%c0_47, %c0_48], %53 {strides = array<i32>} : memref<8x128xf32, #tpu.memory_space<vmem>>, vector<8x128xf32>,
    return
  }
  func.func @transform_0(%arg0: i32) -> (i32, i32) {
    %c0_i32 = arith.constant 0 : i32
    %c0_i32_0 = arith.constant 0 : i32
    return %arg0, %c0_i32 : i32, i32
  }
  func.func @transform_1(%arg0: i32) -> (i32, i32) {
    %c0_i32 = arith.constant 0 : i32
    %c0_i32_0 = arith.constant 0 : i32
    return %arg0, %c0_i32 : i32, i32
  }
  func.func @transform_2(%arg0: i32) -> (i32, i32) {
    %c0_i32 = arith.constant 0 : i32
    %c0_i32_0 = arith.constant 0 : i32
    %c0_i32_1 = arith.constant 0 : i32
    return %c0_i32, %c0_i32_0 : i32, i32
  }
  func.func @transform_3(%arg0: i32) -> (i32, i32) {
    %c0_i32 = arith.constant 0 : i32
    %c0_i32_0 = arith.constant 0 : i32
    %c0_i32_1 = arith.constant 0 : i32
    return %c0_i32, %c0_i32_0 : i32, i32
  }
  func.func @transform_4(%arg0: i32) -> (i32, i32) {
    %c0_i32 = arith.constant 0 : i32
    %c0_i32_0 = arith.constant 0 : i32
    %c0_i32_1 = arith.constant 0 : i32
    return %c0_i32, %c0_i32_0 : i32, i32
  }
  func.func @transform_5(%arg0: i32) -> (i32, i32) {
    %c0_i32 = arith.constant 0 : i32
    %c0_i32_0 = arith.constant 0 : i32
    %c0_i32_1 = arith.constant 0 : i32
    return %c0_i32, %c0_i32_0 : i32, i32
  }
  func.func @transform_6(%arg0: i32) -> (i32, i32) {
    %c0_i32 = arith.constant 0 : i32
    %c0_i32_0 = arith.constant 0 : i32
    %c0_i32_1 = arith.constant 0 : i32
    return %c0_i32, %c0_i32_0 : i32, i32
  }
  func.func @transform_7(%arg0: i32) -> (i32, i32) {
    %c0_i32 = arith.constant 0 : i32
    %c0_i32_0 = arith.constant 0 : i32
    %c0_i32_1 = arith.constant 0 : i32
    return %c0_i32, %c0_i32_0 : i32, i32
  }
  func.func @transform_8(%arg0: i32) -> (i32, i32) {
    %c0_i32 = arith.constant 0 : i32
    %c0_i32_0 = arith.constant 0 : i32
    %c0_i32_1 = arith.constant 0 : i32
    return %c0_i32, %c0_i32_0 : i32, i32
  }
  func.func @transform_9(%arg0: i32) -> (i32, i32) {
    %c0_i32 = arith.constant 0 : i32
    %c0_i32_0 = arith.constant 0 : i32
    %c0_i32_1 = arith.constant 0 : i32
    return %c0_i32, %c0_i32_0 : i32, i32
  }
  func.func @transform_10(%arg0: i32) -> (i32, i32) {
    %c0_i32 = arith.constant 0 : i32
    %c0_i32_0 = arith.constant 0 : i32
    %c0_i32_1 = arith.constant 0 : i32
    return %c0_i32, %c0_i32_0 : i32, i32
  }
  func.func @transform_11(%arg0: i32) -> (i32, i32) {
    %c0_i32 = arith.constant 0 : i32
    %c0_i32_0 = arith.constant 0 : i32
    %c0_i32_1 = arith.constant 0 : i32
    return %c0_i32, %c0_i32_0 : i32, i32
  }
  func.func @transform_12(%arg0: i32) -> (i32, i32) {
    %c0_i32 = arith.constant 0 : i32
    %c0_i32_0 = arith.constant 0 : i32
    %c0_i32_1 = arith.constant 0 : i32
    return %c0_i32, %c0_i32_0 : i32, i32
  }
  func.func @transform_13(%arg0: i32) -> (i32, i32) {
    %c0_i32 = arith.constant 0 : i32
    %c0_i32_0 = arith.constant 0 : i32
    %c0_i32_1 = arith.constant 0 : i32
    return %c0_i32, %c0_i32_0 : i32, i32
  }
  func.func @transform_14(%arg0: i32) -> (i32, i32) {
    %c0_i32 = arith.constant 0 : i32
    %c0_i32_0 = arith.constant 0 : i32
    %c0_i32_1 = arith.constant 0 : i32
    return %c0_i32, %c0_i32_0 : i32, i32
  }
  func.func @transform_15(%arg0: i32) -> (i32, i32) {
    %c0_i32 = arith.constant 0 : i32
    %c0_i32_0 = arith.constant 0 : i32
    %c0_i32_1 = arith.constant 0 : i32
    return %c0_i32, %c0_i32_0 : i32, i32
  }
  func.func @transform_16(%arg0: i32) -> (i32, i32) {
    %c0_i32 = arith.constant 0 : i32
    %c0_i32_0 = arith.constant 0 : i32
    %c0_i32_1 = arith.constant 0 : i32
    return %c0_i32, %c0_i32_0 : i32, i32
  }
  func.func @transform_17(%arg0: i32) -> (i32, i32) {
    %c0_i32 = arith.constant 0 : i32
    %c0_i32_0 = arith.constant 0 : i32
    return %arg0, %c0_i32 : i32, i32
  }
}

</mosaic_0001>

<bundles_post_ra>
// kernel: _forward.1
= control target key start
LH: loop header
LB: loop body
LE: loop exit
PB: predicated region body
PF: predicated region fallthrough
CT: control target
= control target key end

     0   :  { %s2100_s0 = inlined_call_operand.vmem [shape: f32[8,128], index: 0, kind: input, shape index: {}]   ;;  %s2101_s1 = inlined_call_operand.vmem [shape: f32[8,128], index: 1, kind: input, shape index: {}]   ;;  %s2102_s2 = inlined_call_operand.hbm [shape: f32[128,128], index: 2, kind: input, shape index: {}]   ;;  %s2103_s3 = inlined_call_operand.vmem [shape: f32[1,128], index: 3, kind: input, shape index: {}]   ;;  %s2104_s4 = inlined_call_operand.hbm [shape: f32[128,128], index: 4, kind: input, shape index: {}]   ;;  %s2105_s5 = inlined_call_operand.vmem [shape: f32[1,128], index: 5, kind: input, shape index: {}]   ;;  %s2106_s6 = inlined_call_operand.hbm [shape: f32[128,128], index: 6, kind: input, shape index: {}]   ;;  %s2107_s7 = inlined_call_operand.vmem [shape: f32[1,128], index: 7, kind: input, shape index: {}]   ;;  %s2108_s8 = inlined_call_operand.hbm [shape: f32[128,128], index: 8, kind: input, shape index: {}]   ;;  %s2109_s9 = inlined_call_operand.vmem [shape: f32[1,128], index: 9, kind: input, shape index: {}]   ;;  %s2110_s10 = inlined_call_operand.hbm [shape: f32[128,128], index: 10, kind: input, shape index: {}]   ;;  %s2111_s11 = inlined_call_operand.vmem [shape: f32[1,128], index: 11, kind: input, shape index: {}]   ;;  %s2112_s12 = inlined_call_operand.hbm [shape: f32[128,128], index: 12, kind: input, shape index: {}]   ;;  %s2113_s13 = inlined_call_operand.hbm [shape: f32[128,128], index: 13, kind: input, shape index: {}]   ;;  %s2114_s14 = inlined_call_operand.vmem [shape: f32[1,128], index: 14, kind: input, shape index: {}]   ;;  %s2115_s15 = inlined_call_operand.hbm [shape: f32[128,128], index: 15, kind: input, shape index: {}]   ;;  %s2116_s16 = inlined_call_operand.vmem [shape: f32[1,128], index: 16, kind: input, shape index: {}]   ;;  %s2117_s17 = inlined_call_operand.vmem [shape: f32[8,128], index: 17, kind: output, shape index: {}]  }
   0x1   :  { %2118 = sst [smem:[#allocation20_spill]] %s2100_s0 }
   0x2   :  { %2119 = sst [smem:[#allocation21_spill]] %s2101_s1 }
   0x3   :  { %22 = vsyncpa [#allocation3], 0 }
   0x4   :  { %23 = vsyncpa [#allocation5], 0 }
   0x5   :  { %24 = vsyncpa [#allocation8], 0 }
   0x6   :  { %25 = vsyncpa [#allocation11], 0 }
   0x7   :  { %26 = vsyncpa [#allocation14], 0  ;;  %s1736_s24 = smov [#allocation4]   ;;  %s1737_s26 = smov [#allocation7]  }
   0x8   :  { %s50_s25 = sshll.u32 %s1736_s24, 4  ;;  %s78_s27 = sshll.u32 %s1737_s26, 4  ;;  %s51_s25 = int_to_ptr.vmem [resolvable:$true] %s50_s25  ;;  %s1839_s27 = int_to_ptr.vmem [resolvable:$true] %s78_s27 }
   0x9   :  { %s1550_s0 = scalar_lea.hbm %s2104_s4, 2048 }
   0xa   :  { %p1551_p0 = scmp.ne.s32.totalorder %s2104_s4, %s1550_s0  ;;  %p1554_p1 = scmp.lt.u32.totalorder %s1550_s0, %s2104_s4 }
   0xc   :  { %p1556_p2 = pnand %p1554_p1, %p1551_p0 }
   0xe   :  { %1559 = shalt.err (!%p1556_p2)
}
   0xf   :  { %s1560_s20 = scalar_lea.vmem %s51_s25, 2048  ;;  %p1565_p4 = scmp.lt.s32.totalorder %s51_s25, %s51_s25 }
  0x10   :  { %p1561_p3 = scmp.ne.s32.totalorder %s51_s25, %s1560_s20  ;;  %p1566_p5 = scmp.lt.s32.totalorder %s1560_s20, %s1560_s20 }
  0x12   :  { %p1567_p6 = por %p1566_p5, %p1565_p4 }
  0x14   :  { %p1568_p7 = pnand %p1567_p6, %p1561_p3 }
  0x16   :  { %1571 = shalt.err (!%p1568_p7)
}
  0x17   :  { %s1738_s21 = smov 128   ;;  %s1739_s22 = smov 8  }
  0x18   :  { %56 = dma.hbm_to_vmem [thread:$0]  %s2104_s4, 2048, %s51_s25, [#allocation5], %s1738_s21, %s1738_s21, %s1739_s22  }
  0x19   :  { %s1572_s29 = scalar_lea.hbm %s2108_s8, 2048 }
  0x1a   :  { %p1573_p8 = scmp.ne.s32.totalorder %s2108_s8, %s1572_s29  ;;  %p1576_p9 = scmp.lt.u32.totalorder %s1572_s29, %s2108_s8 }
  0x1c   :  { %p1578_p10 = pnand %p1576_p9, %p1573_p8 }
  0x1e   :  { %1581 = shalt.err (!%p1578_p10)
}
  0x1f   :  { %s1582_s1 = scalar_lea.vmem %s1839_s27, 2048  ;;  %p1587_p12 = scmp.lt.s32.totalorder %s1839_s27, %s1839_s27 }
  0x20   :  { %p1583_p11 = scmp.ne.s32.totalorder %s1839_s27, %s1582_s1  ;;  %p1588_p13 = scmp.lt.s32.totalorder %s1582_s1, %s1582_s1 }
  0x22   :  { %p1589_p0 = por %p1588_p13, %p1587_p12 }
  0x24   :  { %p1590_p1 = pnand %p1589_p0, %p1583_p11 }
  0x26   :  { %1593 = shalt.err (!%p1590_p1)
}
  0x27   :  { %84 = dma.hbm_to_vmem [thread:$0]  %s2108_s8, 2048, %s1839_s27, [#allocation8], %s1738_s21, %s1738_s21, %s1739_s22  }
  0x28   :  { %s1740_s20 = smov [#allocation10]   ;;  %s1741_s24 = smov [#allocation2]  }
  0x29   :  { %s106_s23 = sshll.u32 %s1740_s20, 4  ;;  %s36_s26 = sshll.u32 %s1741_s24, 4  ;;  %s107_s23 = int_to_ptr.vmem [resolvable:$true] %s106_s23  ;;  %s1876_s26 = int_to_ptr.vmem [resolvable:$true] %s36_s26 }
  0x2a   :  { %s1594_s0 = scalar_lea.hbm %s2112_s12, 2048 }
  0x2b   :  { %p1595_p2 = scmp.ne.s32.totalorder %s2112_s12, %s1594_s0  ;;  %p1598_p3 = scmp.lt.u32.totalorder %s1594_s0, %s2112_s12 }
  0x2d   :  { %p1600_p4 = pnand %p1598_p3, %p1595_p2 }
  0x2f   :  { %1603 = shalt.err (!%p1600_p4)
}
  0x30   :  { %s1604_s8 = scalar_lea.vmem %s107_s23, 2048  ;;  %p1609_p6 = scmp.lt.s32.totalorder %s107_s23, %s107_s23 }
  0x31   :  { %p1605_p5 = scmp.ne.s32.totalorder %s107_s23, %s1604_s8  ;;  %p1610_p7 = scmp.lt.s32.totalorder %s1604_s8, %s1604_s8 }
  0x33   :  { %p1611_p8 = por %p1610_p7, %p1609_p6 }
  0x35   :  { %p1612_p9 = pnand %p1611_p8, %p1605_p5 }
  0x37   :  { %1615 = shalt.err (!%p1612_p9)
}
  0x38   :  { %112 = dma.hbm_to_vmem [thread:$0]  %s2112_s12, 2048, %s107_s23, [#allocation11], %s1738_s21, %s1738_s21, %s1739_s22  }
  0x39   :  { %s1616_s24 = scalar_lea.hbm %s2102_s2, 2048 }
  0x3a   :  { %p1617_p10 = scmp.ne.s32.totalorder %s2102_s2, %s1616_s24  ;;  %p1620_p11 = scmp.lt.u32.totalorder %s1616_s24, %s2102_s2 }
  0x3c   :  { %p1622_p12 = pnand %p1620_p11, %p1617_p10 }
  0x3e   :  { %1625 = shalt.err (!%p1622_p12)
}
  0x3f   :  { %s1626_s18 = scalar_lea.vmem %s1876_s26, 2048  ;;  %p1631_p0 = scmp.lt.s32.totalorder %s1876_s26, %s1876_s26 }
  0x40   :  { %p1627_p13 = scmp.ne.s32.totalorder %s1876_s26, %s1626_s18  ;;  %p1632_p1 = scmp.lt.s32.totalorder %s1626_s18, %s1626_s18 }
  0x42   :  { %p1633_p2 = por %p1632_p1, %p1631_p0 }
  0x44   :  { %p1634_p3 = pnand %p1633_p2, %p1627_p13 }
  0x46   :  { %1637 = shalt.err (!%p1634_p3)
}
  0x47   :  { %42 = dma.hbm_to_vmem [thread:$0]  %s2102_s2, 2048, %s1876_s26, [#allocation3], %s1738_s21, %s1738_s21, %s1739_s22  }
  0x48   :  { %s1742_s19 = smov [#allocation6]   ;;  %s1743_s8 = smov [#allocation9]  }
  0x49   :  { %s64_s1 = sshll.u32 %s1742_s19, 4  ;;  %s92_s27 = sshll.u32 %s1743_s8, 4  ;;  %s65_s1 = int_to_ptr.vmem [resolvable:$true] %s64_s1  ;;  %s1913_s27 = int_to_ptr.vmem [resolvable:$true] %s92_s27 }
  0x4a   :  { %s1638_s20 = scalar_lea.hbm %s2106_s6, 2048 }
  0x4b   :  { %p1639_p4 = scmp.ne.s32.totalorder %s2106_s6, %s1638_s20  ;;  %p1642_p5 = scmp.lt.u32.totalorder %s1638_s20, %s2106_s6 }
  0x4d   :  { %p1644_p6 = pnand %p1642_p5, %p1639_p4 }
  0x4f   :  { %1647 = shalt.err (!%p1644_p6)
}
  0x50   :  { %s1648_s2 = scalar_lea.vmem %s65_s1, 2048  ;;  %p1653_p8 = scmp.lt.s32.totalorder %s65_s1, %s65_s1 }
  0x51   :  { %p1649_p7 = scmp.ne.s32.totalorder %s65_s1, %s1648_s2  ;;  %p1654_p9 = scmp.lt.s32.totalorder %s1648_s2, %s1648_s2 }
  0x53   :  { %p1655_p10 = por %p1654_p9, %p1653_p8 }
  0x55   :  { %p1656_p11 = pnand %p1655_p10, %p1649_p7 }
  0x57   :  { %1659 = shalt.err (!%p1656_p11)
}
  0x58   :  { %70 = dma.hbm_to_vmem [thread:$0]  %s2106_s6, 2048, %s65_s1, [#allocation5], %s1738_s21, %s1738_s21, %s1739_s22  }
  0x59   :  { %s1660_s23 = scalar_lea.hbm %s2110_s10, 2048 }
  0x5a   :  { %p1661_p12 = scmp.ne.s32.totalorder %s2110_s10, %s1660_s23  ;;  %p1664_p13 = scmp.lt.u32.totalorder %s1660_s23, %s2110_s10 }
  0x5c   :  { %p1666_p0 = pnand %p1664_p13, %p1661_p12 }
  0x5e   :  { %1669 = shalt.err (!%p1666_p0)
}
  0x5f   :  { %s1670_s20 = scalar_lea.vmem %s1913_s27, 2048  ;;  %p1675_p2 = scmp.lt.s32.totalorder %s1913_s27, %s1913_s27 }
  0x60   :  { %p1671_p1 = scmp.ne.s32.totalorder %s1913_s27, %s1670_s20  ;;  %p1676_p3 = scmp.lt.s32.totalorder %s1670_s20, %s1670_s20 }
  0x62   :  { %p1677_p4 = por %p1676_p3, %p1675_p2 }
  0x64   :  { %p1678_p5 = pnand %p1677_p4, %p1671_p1 }
  0x66   :  { %1681 = shalt.err (!%p1678_p5)
}
  0x67   :  { %98 = dma.hbm_to_vmem [thread:$0]  %s2110_s10, 2048, %s1913_s27, [#allocation8], %s1738_s21, %s1738_s21, %s1739_s22  }
  0x68   :  { %s1744_s24 = smov [#allocation12]   ;;  %s1745_s29 = smov [#allocation13]  }
  0x69   :  { %s118_s28 = sshll.u32 %s1744_s24, 4  ;;  %s132_s0 = sshll.u32 %s1745_s29, 4  ;;  %s119_s28 = int_to_ptr.vmem [resolvable:$true] %s118_s28  ;;  %s1950_s0 = int_to_ptr.vmem [resolvable:$true] %s132_s0 }
  0x6a   :  { %s1682_s30 = scalar_lea.hbm %s2113_s13, 2048 }
  0x6b   :  { %p1683_p6 = scmp.ne.s32.totalorder %s2113_s13, %s1682_s30  ;;  %p1686_p7 = scmp.lt.u32.totalorder %s1682_s30, %s2113_s13 }
  0x6d   :  { %p1688_p8 = pnand %p1686_p7, %p1683_p6 }
  0x6f   :  { %1691 = shalt.err (!%p1688_p8)
}
  0x70   :  { %s1692_s10 = scalar_lea.vmem %s119_s28, 2048  ;;  %p1697_p10 = scmp.lt.s32.totalorder %s119_s28, %s119_s28 }
  0x71   :  { %p1693_p9 = scmp.ne.s32.totalorder %s119_s28, %s1692_s10  ;;  %p1698_p11 = scmp.lt.s32.totalorder %s1692_s10, %s1692_s10 }
  0x73   :  { %p1699_p12 = por %p1698_p11, %p1697_p10 }
  0x75   :  { %p1700_p13 = pnand %p1699_p12, %p1693_p9 }
  0x77   :  { %1703 = shalt.err (!%p1700_p13)
}
  0x78   :  { %124 = dma.hbm_to_vmem [thread:$0]  %s2113_s13, 2048, %s119_s28, [#allocation11], %s1738_s21, %s1738_s21, %s1739_s22  }
  0x79   :  { %s1704_s20 = scalar_lea.hbm %s2115_s15, 2048 }
  0x7a   :  { %p1705_p0 = scmp.ne.s32.totalorder %s2115_s15, %s1704_s20  ;;  %p1708_p1 = scmp.lt.u32.totalorder %s1704_s20, %s2115_s15 }
  0x7c   :  { %p1710_p2 = pnand %p1708_p1, %p1705_p0 }
  0x7e   :  { %1713 = shalt.err (!%p1710_p2)
}
  0x7f   :  { %s1714_s2 = scalar_lea.vmem %s1950_s0, 2048  ;;  %p1719_p4 = scmp.lt.s32.totalorder %s1950_s0, %s1950_s0 }
  0x80   :  { %p1715_p3 = scmp.ne.s32.totalorder %s1950_s0, %s1714_s2  ;;  %p1720_p5 = scmp.lt.s32.totalorder %s1714_s2, %s1714_s2 }
  0x82   :  { %p1721_p6 = por %p1720_p5, %p1719_p4 }
  0x84   :  { %p1722_p7 = pnand %p1721_p6, %p1715_p3 }
  0x86   :  { %1725 = shalt.err (!%p1722_p7)
}
  0x87   :  { %138 = dma.hbm_to_vmem [thread:$0]  %s2115_s15, 2048, %s1950_s0, [#allocation14], %s1738_s21, %s1738_s21, %s1739_s22  }
  0x88   :  { %1726 = dma.done.wait [#allocation3], 2048  }
  0x89   :  { %1727 = vsyncadd [#allocation3], 4294965248 }
  0x8a   :  { %1728 = dma.done.wait [#allocation5], 4096  }
  0x8b   :  { %1729 = vsyncadd [#allocation5], 4294963200 }
  0x8c   :  { %1730 = dma.done.wait [#allocation8], 4096  }
  0x8d   :  { %1731 = vsyncadd [#allocation8], 4294963200 }
  0x8e   :  { %1732 = dma.done.wait [#allocation11], 4096  }
  0x8f   :  { %1733 = vsyncadd [#allocation11], 4294963200 }
  0x90   :  { %1734 = dma.done.wait [#allocation14], 2048  }
  0x91   :  { %1735 = vsyncadd [#allocation14], 4294965248  ;;  %v1746_v0 = vmov 0.0|0.0   ;;  %vm1747_vm0 = vmmov 0   ;;  %v1748_v1 = vmov 0.0   ;;  %v277_v2 = vld [vmem:[#allocation4] sm:$0xff] }
  0x92   :  { %1369 = vmatprep.subr.bf16.mxu1 %v1746_v0  ;;  %1132 = vmatprep.mubr.msk.f32.mxu1 %vm1747_vm0, %v1748_v1  ;;  %v278_v3 = vld [vmem:[#allocation4 + $0x8] sm:$0xff]  ;;  %v279_v4 = vld [vmem:[#allocation4 + $0x10] sm:$0xff]  ;;  %v280_v6 = vld [vmem:[#allocation4 + $0x18] sm:$0xff]  ;;  %s2120_s22 = sld [smem:[#allocation21_spill]]  ;;  %s2121_s30 = sld [smem:[#allocation20_spill]] }
  0x93   :  { %1345 = vmatprep.subr.bf16.mxu0 %v1746_v0  ;;  %1097 = vmatprep.mubr.msk.f32.mxu0 %vm1747_vm0, %v1748_v1  ;;  %v1370_v5 = vpack.c.bf16 %v278_v3, %v277_v2  ;;  %v1373_v7 = vpack.c.bf16 %v280_v6, %v279_v4  ;;  %v281_v8 = vld [vmem:[#allocation4 + $0x20] sm:$0xff]  ;;  %v282_v9 = vld [vmem:[#allocation4 + $0x28] sm:$0xff]  ;;  %v168_v12 = vld [vmem:[#allocation2 + $0x10] sm:$0xff] }
  0x94   :  { %v166_v10 = vld [vmem:[#allocation2] sm:$0xff]  ;;  %v167_v11 = vld [vmem:[#allocation2 + $0x8] sm:$0xff]  ;;  %v169_v13 = vld [vmem:[#allocation2 + $0x18] sm:$0xff]  ;;  %v1376_v14 = vpack.c.bf16 %v282_v9, %v281_v8 }
  0x95   :  { %1371 = vmatpush3.bf16.msra.mxu1 %v1370_v5  ;;  %v1346_v15 = vpack.c.bf16 %v167_v11, %v166_v10  ;;  %v283_v16 = vld [vmem:[#allocation4 + $0x30] sm:$0xff]  ;;  %v284_v17 = vld [vmem:[#allocation4 + $0x38] sm:$0xff]  ;;  %v1349_v18 = vpack.c.bf16 %v169_v13, %v168_v12  ;;  %v170_v19 = vld [vmem:[#allocation2 + $0x20] sm:$0xff] }
  0x96   :  { %1372 = vmatprep.subr.bf16.mxu1 %v1746_v0  ;;  %v171_v20 = vld [vmem:[#allocation2 + $0x28] sm:$0xff]  ;;  %v1379_v21 = vpack.c.bf16 %v284_v17, %v283_v16  ;;  %v285_v22 = vld [vmem:[#allocation4 + $0x40] sm:$0xff]  ;;  %v172_v25 = vld [vmem:[#allocation2 + $0x30] sm:$0xff] }
  0x97   :  { %1347 = vmatpush3.bf16.msra.mxu0 %v1346_v15  ;;  %v286_v23 = vld [vmem:[#allocation4 + $0x48] sm:$0xff]  ;;  %v1352_v24 = vpack.c.bf16 %v171_v20, %v170_v19  ;;  %v173_v26 = vld [vmem:[#allocation2 + $0x38] sm:$0xff]  ;;  %v287_v28 = vld [vmem:[#allocation4 + $0x50] sm:$0xff] }
  0x98   :  { %1348 = vmatprep.subr.bf16.mxu0 %v1746_v0  ;;  %v1382_v27 = vpack.c.bf16 %v286_v23, %v285_v22  ;;  %v288_v29 = vld [vmem:[#allocation4 + $0x58] sm:$0xff]  ;;  %v1355_v30 = vpack.c.bf16 %v173_v26, %v172_v25  ;;  %v174_v31 = vld [vmem:[#allocation2 + $0x40] sm:$0xff]  ;;  %v175_v32 = vld [vmem:[#allocation2 + $0x48] sm:$0xff] }
  0x99   :  { %1374 = vmatpush3.bf16.msra.mxu1 %v1373_v7  ;;  %v1385_v33 = vpack.c.bf16 %v288_v29, %v287_v28  ;;  %v289_v34 = vld [vmem:[#allocation4 + $0x60] sm:$0xff]  ;;  %v290_v35 = vld [vmem:[#allocation4 + $0x68] sm:$0xff]  ;;  %v1358_v36 = vpack.c.bf16 %v175_v32, %v174_v31  ;;  %v176_v37 = vld [vmem:[#allocation2 + $0x50] sm:$0xff] }
  0x9a   :  { %1375 = vmatprep.subr.bf16.mxu1 %v1746_v0  ;;  %v177_v38 = vld [vmem:[#allocation2 + $0x58] sm:$0xff]  ;;  %v1388_v39 = vpack.c.bf16 %v290_v35, %v289_v34  ;;  %v291_v40 = vld [vmem:[#allocation4 + $0x70] sm:$0xff]  ;;  %v178_v43 = vld [vmem:[#allocation2 + $0x60] sm:$0xff] }
  0x9b   :  { %1350 = vmatpush3.bf16.msra.mxu0 %v1349_v18  ;;  %v292_v41 = vld [vmem:[#allocation4 + $0x78] sm:$0xff]  ;;  %v1361_v42 = vpack.c.bf16 %v177_v38, %v176_v37  ;;  %v179_v44 = vld [vmem:[#allocation2 + $0x68] sm:$0xff]  ;;  %v180_v47 = vld [vmem:[#allocation2 + $0x70] sm:$0xff] }
  0x9c   :  { %1351 = vmatprep.subr.bf16.mxu0 %v1746_v0  ;;  %v1391_v45 = vpack.c.bf16 %v292_v41, %v291_v40  ;;  %v1364_v46 = vpack.c.bf16 %v179_v44, %v178_v43  ;;  %v181_v48 = vld [vmem:[#allocation2 + $0x78] sm:$0xff]  ;;  %v371_v51 = vld [vmem:[#allocation6] sm:$0xff]  ;;  %v372_v52 = vld [vmem:[#allocation6 + $0x8] sm:$0xff] }
  0x9d   :  { %1377 = vmatpush3.bf16.msra.mxu1 %v1376_v14  ;;  %v276_v49 = vld [vmem:[%s2120_s22] sm:$0xff]  ;;  %v1367_v50 = vpack.c.bf16 %v181_v48, %v180_v47  ;;  %v1394_v54 = vpack.c.bf16 %v372_v52, %v371_v51  ;;  %v373_v55 = vld [vmem:[#allocation6 + $0x10] sm:$0xff]  ;;  %v375_v58 = vld [vmem:[#allocation6 + $0x20] sm:$0xff] }
  0x9e   :  { %1378 = vmatprep.subr.bf16.mxu1 %v1746_v0  ;;  %v165_v53 = vld [vmem:[%s2121_s30] sm:$0xff]  ;;  %v376_v59 = vld [vmem:[#allocation6 + $0x28] sm:$0xff]  ;;  %v377_v61 = vld [vmem:[#allocation6 + $0x30] sm:$0xff] }
  0x9f   :  { %1353 = vmatpush3.bf16.msra.mxu0 %v1352_v24  ;;  %v374_v56 = vld [vmem:[#allocation6 + $0x18] sm:$0xff]  ;;  %v1400_v60 = vpack.c.bf16 %v376_v59, %v375_v58  ;;  %v379_v2 = vld [vmem:[#allocation6 + $0x40] sm:$0xff]  ;;  %v380_v3 = vld [vmem:[#allocation6 + $0x48] sm:$0xff] }
  0xa0   :  { %1354 = vmatprep.subr.bf16.mxu0 %v1746_v0  ;;  %v1397_v57 = vpack.c.bf16 %v374_v56, %v373_v55  ;;  %v378_v62 = vld [vmem:[#allocation6 + $0x38] sm:$0xff]  ;;  %v1406_v4 = vpack.c.bf16 %v380_v3, %v379_v2  ;;  %v381_v5 = vld [vmem:[#allocation6 + $0x50] sm:$0xff]  ;;  %v383_v8 = vld [vmem:[#allocation6 + $0x60] sm:$0xff] }
  0xa1   :  { %1380 = vmatpush3.bf16.msra.mxu1 %v1379_v21  ;;  %v1403_v63 = vpack.c.bf16 %v378_v62, %v377_v61  ;;  %v382_v6 = vld [vmem:[#allocation6 + $0x58] sm:$0xff]  ;;  %v384_v9 = vld [vmem:[#allocation6 + $0x68] sm:$0xff]  ;;  %v385_v11 = vld [vmem:[#allocation6 + $0x70] sm:$0xff] }
  0xa2   :  { %1381 = vmatprep.subr.bf16.mxu1 %v1746_v0  ;;  %v1409_v7 = vpack.c.bf16 %v382_v6, %v381_v5  ;;  %v1412_v10 = vpack.c.bf16 %v384_v9, %v383_v8  ;;  %v386_v12 = vld [vmem:[#allocation6 + $0x78] sm:$0xff]  ;;  %v465_v14 = vld [vmem:[#allocation7] sm:$0xff]  ;;  %v466_v15 = vld [vmem:[#allocation7 + $0x8] sm:$0xff] }
  0xa3   :  { %1356 = vmatpush3.bf16.msra.mxu0 %v1355_v30  ;;  %v1415_v13 = vpack.c.bf16 %v386_v12, %v385_v11  ;;  %v467_v16 = vld [vmem:[#allocation7 + $0x10] sm:$0xff]  ;;  %v1418_v17 = vpack.c.bf16 %v466_v15, %v465_v14  ;;  %v468_v18 = vld [vmem:[#allocation7 + $0x18] sm:$0xff]  ;;  %v469_v20 = vld [vmem:[#allocation7 + $0x20] sm:$0xff] }
  0xa4   :  { %1357 = vmatprep.subr.bf16.mxu0 %v1746_v0  ;;  %v1421_v19 = vpack.c.bf16 %v468_v18, %v467_v16  ;;  %v470_v21 = vld [vmem:[#allocation7 + $0x28] sm:$0xff]  ;;  %v471_v23 = vld [vmem:[#allocation7 + $0x30] sm:$0xff]  ;;  %v472_v24 = vld [vmem:[#allocation7 + $0x38] sm:$0xff] }
  0xa5   :  { %1383 = vmatpush3.bf16.msra.mxu1 %v1382_v27  ;;  %v1424_v22 = vpack.c.bf16 %v470_v21, %v469_v20  ;;  %v1427_v25 = vpack.c.bf16 %v472_v24, %v471_v23  ;;  %v473_v26 = vld [vmem:[#allocation7 + $0x40] sm:$0xff]  ;;  %v474_v27 = vld [vmem:[#allocation7 + $0x48] sm:$0xff]  ;;  %v475_v29 = vld [vmem:[#allocation7 + $0x50] sm:$0xff] }
  0xa6   :  { %1384 = vmatprep.subr.bf16.mxu1 %v1746_v0  ;;  %v1430_v28 = vpack.c.bf16 %v474_v27, %v473_v26  ;;  %v476_v30 = vld [vmem:[#allocation7 + $0x58] sm:$0xff]  ;;  %v477_v32 = vld [vmem:[#allocation7 + $0x60] sm:$0xff]  ;;  %v561_v47 = vld [vmem:[#allocation9 + $0x10] sm:$0xff] }
  0xa7   :  { %1359 = vmatpush3.bf16.msra.mxu0 %v1358_v36  ;;  %v1433_v31 = vpack.c.bf16 %v476_v30, %v475_v29  ;;  %v923_v35 = vld [vmem:[%s2105_s5] ss:$0 sm:$0xff]  ;;  %v563_v51 = vld [vmem:[#allocation9 + $0x20] sm:$0xff]  ;;  %v564_v52 = vld [vmem:[#allocation9 + $0x28] sm:$0xff] }
  0xa8   :  { %1360 = vmatprep.subr.bf16.mxu0 %v1746_v0  ;;  %v480_v43 = vld [vmem:[#allocation7 + $0x78] sm:$0xff]  ;;  %v568_v58 = vld [vmem:[#allocation9 + $0x48] sm:$0xff]  ;;  %v573_v9 = vld [vmem:[#allocation9 + $0x70] sm:$0xff] }
  0xa9   :  { %1386 = vmatpush3.bf16.msra.mxu1 %v1385_v33  ;;  %v478_v33 = vld [vmem:[#allocation7 + $0x68] sm:$0xff]  ;;  %v566_v55 = vld [vmem:[#allocation9 + $0x38] sm:$0xff]  ;;  %v653_v12 = vld [vmem:[#allocation12] sm:$0xff] }
  0xaa   :  { %1387 = vmatprep.subr.bf16.mxu1 %v1746_v0  ;;  %v1436_v34 = vpack.c.bf16 %v478_v33, %v477_v32  ;;  %v570_v61 = vld [vmem:[#allocation9 + $0x58] sm:$0xff]  ;;  %v572_v2 = vld [vmem:[#allocation9 + $0x68] sm:$0xff]  ;;  %v655_v14 = vld [vmem:[#allocation12 + $0x10] sm:$0xff] }
  0xab   :  { %1362 = vmatpush3.bf16.msra.mxu0 %v1361_v42  ;;  %v479_v42 = vld [vmem:[#allocation7 + $0x70] sm:$0xff]  ;;  %v656_v16 = vld [vmem:[#allocation12 + $0x18] sm:$0xff]  ;;  %v657_v18 = vld [vmem:[#allocation12 + $0x20] sm:$0xff] }
  0xac   :  { %1363 = vmatprep.subr.bf16.mxu0 %v1746_v0  ;;  %v1439_v44 = vpack.c.bf16 %v480_v43, %v479_v42  ;;  %v659_v21 = vld [vmem:[#allocation12 + $0x30] sm:$0xff]  ;;  %v661_v24 = vld [vmem:[#allocation12 + $0x40] sm:$0xff]  ;;  %v925_v33 = vld [vmem:[%s2109_s9] ss:$0 sm:$0xff] }
  0xad   :  { %1389 = vmatpush3.bf16.msra.mxu1 %v1388_v39  ;;  %v663_v27 = vld [vmem:[#allocation12 + $0x50] sm:$0xff]  ;;  %v665_v30 = vld [vmem:[#allocation12 + $0x60] sm:$0xff]  ;;  %v263_v43 = vld [vmem:[#allocation10 + $0x18] sm:$0xff] }
  0xae   :  { %1390 = vmatprep.subr.bf16.mxu1 %v1746_v0  ;;  %v262_v42 = vld [vmem:[#allocation10 + $0x10] sm:$0xff] }
  0xaf   :  { %1365 = vmatpush3.bf16.msra.mxu0 %v1364_v46  ;;  %v560_v46 = vld [vmem:[#allocation9 + $0x8] sm:$0xff] }
  0xb0   :  { %1366 = vmatprep.subr.bf16.mxu0 %v1746_v0 }
  0xb1   :  { %1392 = vmatpush3.bf16.msra.mxu1 %v1391_v45  ;;  %v559_v45 = vld [vmem:[#allocation9] sm:$0xff] }
  0xb2   :  { %1417 = vmatprep.subr.bf16.mxu1 %v1746_v0  ;;  %v1442_v48 = vpack.c.bf16 %v560_v46, %v559_v45  ;;  %v264_v45 = vld [vmem:[#allocation10 + $0x20] sm:$0xff]  ;;  %v265_v46 = vld [vmem:[#allocation10 + $0x28] sm:$0xff] }
  0xb3   :  { %1368 = vmatpush3.bf16.msra.mxu0 %v1367_v50 }
  0xb4   :  { %1133 = vmatmul.mubr.f32.vlgmr.msra.gmra.mrb[0].mxu1 %v276_v49  ;;  %1393 = vmatprep.subr.bf16.mxu0 %v1746_v0  ;;  %v562_v49 = vld [vmem:[#allocation9 + $0x18] sm:$0xff] }
  0xb5   :  { %1202 = vmatprep.mubr.msk.f32.mxu1 %vm1747_vm0, %v1748_v1  ;;  %1419 = vmatpush3.bf16.msra.mxu1 %v1418_v17  ;;  %v1445_v50 = vpack.c.bf16 %v562_v49, %v561_v47  ;;  %v1469_v17 = vpack.c.bf16 %v656_v16, %v655_v14  ;;  %v1496_v47 = vpack.c.bf16 %v265_v46, %v264_v45  ;;  %v267_v49 = vld [vmem:[#allocation10 + $0x38] sm:$0xff]  ;;  %v820_v14 = vld [vmem:[#allocation13 + $0x10] sm:$0xff] }
  0xb6   :  { %1098 = vmatmul.mubr.f32.vlgmr.msra.gmra.mrb[0].mxu0 %v165_v53  ;;  %1420 = vmatprep.subr.bf16.mxu1 %v1746_v0  ;;  %v1448_v53 = vpack.c.bf16 %v564_v52, %v563_v51  ;;  %v268_v51 = vld [vmem:[#allocation10 + $0x40] sm:$0xff]  ;;  %v269_v52 = vld [vmem:[#allocation10 + $0x48] sm:$0xff] }
  0xb7   :  { %1395 = vmatpush3.bf16.msra.mxu0 %v1394_v54  ;;  %1167 = vmatprep.mubr.msk.f32.mxu0 %vm1747_vm0, %v1748_v1  ;;  %v565_v54 = vld [vmem:[#allocation9 + $0x30] sm:$0xff] }
  0xb8   :  { %1396 = vmatprep.subr.bf16.mxu0 %v1746_v0  ;;  %v1451_v56 = vpack.c.bf16 %v566_v55, %v565_v54  ;;  %v270_v54 = vld [vmem:[#allocation10 + $0x50] sm:$0xff]  ;;  %v271_v55 = vld [vmem:[#allocation10 + $0x58] sm:$0xff] }
  0xb9   :  { %1422 = vmatpush3.bf16.msra.mxu1 %v1421_v19  ;;  %v658_v19 = vld [vmem:[#allocation12 + $0x28] sm:$0xff] }
  0xba   :  { %1423 = vmatprep.subr.bf16.mxu1 %v1746_v0  ;;  %v1472_v20 = vpack.c.bf16 %v658_v19, %v657_v18  ;;  %v823_v18 = vld [vmem:[#allocation13 + $0x28] sm:$0xff] }
  0xbb   :  { %1398 = vmatpush3.bf16.msra.mxu0 %v1397_v57  ;;  %v567_v57 = vld [vmem:[#allocation9 + $0x40] sm:$0xff] }
  0xbc   :  { %1399 = vmatprep.subr.bf16.mxu0 %v1746_v0  ;;  %v1454_v59 = vpack.c.bf16 %v568_v58, %v567_v57  ;;  %v272_v57 = vld [vmem:[#allocation10 + $0x60] sm:$0xff]  ;;  %v273_v58 = vld [vmem:[#allocation10 + $0x68] sm:$0xff] }
  0xbd   :  { %1425 = vmatpush3.bf16.msra.mxu1 %v1424_v22  ;;  %v660_v22 = vld [vmem:[#allocation12 + $0x38] sm:$0xff] }
  0xbe   :  { %1426 = vmatprep.subr.bf16.mxu1 %v1746_v0  ;;  %v1475_v23 = vpack.c.bf16 %v660_v22, %v659_v21  ;;  %v825_v21 = vld [vmem:[#allocation13 + $0x38] sm:$0xff] }
  0xbf   :  { %1401 = vmatpush3.bf16.msra.mxu0 %v1400_v60  ;;  %v569_v60 = vld [vmem:[#allocation9 + $0x50] sm:$0xff] }
  0xc0   :  { %1402 = vmatprep.subr.bf16.mxu0 %v1746_v0  ;;  %v1457_v62 = vpack.c.bf16 %v570_v61, %v569_v60  ;;  %v274_v60 = vld [vmem:[#allocation10 + $0x70] sm:$0xff]  ;;  %v275_v61 = vld [vmem:[#allocation10 + $0x78] sm:$0xff] }
  0xc1   :  { %1428 = vmatpush3.bf16.msra.mxu1 %v1427_v25  ;;  %v662_v25 = vld [vmem:[#allocation12 + $0x48] sm:$0xff] }
  0xc2   :  { %1429 = vmatprep.subr.bf16.mxu1 %v1746_v0  ;;  %v1478_v26 = vpack.c.bf16 %v662_v25, %v661_v24  ;;  %v827_v24 = vld [vmem:[#allocation13 + $0x48] sm:$0xff] }
  0xc3   :  { %1404 = vmatpush3.bf16.msra.mxu0 %v1403_v63  ;;  %v571_v63 = vld [vmem:[#allocation9 + $0x60] sm:$0xff] }
  0xc4   :  { %1405 = vmatprep.subr.bf16.mxu0 %v1746_v0  ;;  %v1460_v3 = vpack.c.bf16 %v572_v2, %v571_v63  ;;  %v1511_v63 = vpack.c.bf16 %v275_v61, %v274_v60 }
  0xc5   :  { %1431 = vmatpush3.bf16.msra.mxu1 %v1430_v28  ;;  %v664_v28 = vld [vmem:[#allocation12 + $0x58] sm:$0xff] }
  0xc6   :  { %1432 = vmatprep.subr.bf16.mxu1 %v1746_v0  ;;  %v1481_v29 = vpack.c.bf16 %v664_v28, %v663_v27 }
  0xc7   :  { %1407 = vmatpush3.bf16.msra.mxu0 %v1406_v4  ;;  %v924_v4 = vld [vmem:[%s2107_s7] ss:$0 sm:$0xff] }
  0xc8   :  { %1408 = vmatprep.subr.bf16.mxu0 %v1746_v0 }
  0xc9   :  { %1434 = vmatpush3.bf16.msra.mxu1 %v1433_v31  ;;  %v666_v31 = vld [vmem:[#allocation12 + $0x68] sm:$0xff] }
  0xca   :  { %1435 = vmatprep.subr.bf16.mxu1 %v1746_v0  ;;  %v1484_v32 = vpack.c.bf16 %v666_v31, %v665_v30  ;;  %v830_v30 = vld [vmem:[#allocation13 + $0x60] sm:$0xff]  ;;  %v831_v31 = vld [vmem:[#allocation13 + $0x68] sm:$0xff] }
  0xcb   :  { %1410 = vmatpush3.bf16.msra.mxu0 %v1409_v7 }
  0xcc   :  { %1411 = vmatprep.subr.bf16.mxu0 %v1746_v0 }
  0xcd   :  { %1437 = vmatpush3.bf16.msra.mxu1 %v1436_v34  ;;  %v260_v34 = vld [vmem:[#allocation10] sm:$0xff] }
  0xce   :  { %1438 = vmatprep.subr.bf16.mxu1 %v1746_v0 }
  0xcf   :  { %1413 = vmatpush3.bf16.msra.mxu0 %v1412_v10  ;;  %v574_v10 = vld [vmem:[#allocation9 + $0x78] sm:$0xff] }
  0xd0   :  { %1414 = vmatprep.subr.bf16.mxu0 %v1746_v0  ;;  %v1463_v11 = vpack.c.bf16 %v574_v10, %v573_v9  ;;  %v819_v9 = vld [vmem:[#allocation13 + $0x8] sm:$0xff] }
  0xd1   :  { %1440 = vmatpush3.bf16.msra.mxu1 %v1439_v44  ;;  %v1493_v44 = vpack.c.bf16 %v263_v43, %v262_v42  ;;  %v928_v43 = vld [vmem:[%s2116_s16] ss:$0 sm:$0xff] }
  0xd2   :  { %1465 = vmatprep.subr.bf16.mxu1 %v1746_v0 }
  0xd3   :  { %1416 = vmatpush3.bf16.msra.mxu0 %v1415_v13  ;;  %v654_v13 = vld [vmem:[#allocation12 + $0x8] sm:$0xff] }
  0xd4   :  { %1441 = vmatprep.subr.bf16.mxu0 %v1746_v0  ;;  %v1466_v15 = vpack.c.bf16 %v654_v13, %v653_v12 }
 0x187   :  { %v366_v36 = vpop.f32.mrb[0].mxu1 }
 0x188   :  { %v367_v37 = vadd.f32 %v923_v35, %v366_v36  ;;  %v1134_v38 = vpop.f32.mrb[1].mxu1  ;;  %v261_v35 = vld [vmem:[#allocation10 + $0x8] sm:$0xff] }
 0x189   :  { %v2037_v40 = vpop.f32.mrb[0].mxu0 }
 0x18a   :  { %v370_v39 = vmax.f32 %v367_v37, 0.0  ;;  %v1099_v41 = vpop.f32.mrb[1].mxu0 }
 0x18c   :  { %1168 = vmatmul.mubr.f32.vlgmr.msra.gmra.mrb[2].mxu0 %v370_v39  ;;  %v1490_v39 = vpack.c.bf16 %v261_v35, %v260_v34  ;;  %v833_v34 = vld [vmem:[#allocation13 + $0x78] sm:$0xff] }
 0x18d   :  { %1237 = vmatprep.mubr.msk.f32.mxu0 %vm1747_vm0, %v1748_v1  ;;  %1443 = vmatpush3.bf16.msra.mxu0 %v1442_v48  ;;  %v266_v48 = vld [vmem:[#allocation10 + $0x30] sm:$0xff] }
 0x18e   :  { %1444 = vmatprep.subr.bf16.mxu0 %v1746_v0 }
 0x191   :  { %1446 = vmatpush3.bf16.msra.mxu0 %v1445_v50  ;;  %v1499_v50 = vpack.c.bf16 %v267_v49, %v266_v48 }
 0x192   :  { %1447 = vmatprep.subr.bf16.mxu0 %v1746_v0 }
 0x195   :  { %1449 = vmatpush3.bf16.msra.mxu0 %v1448_v53  ;;  %v1502_v53 = vpack.c.bf16 %v269_v52, %v268_v51 }
 0x196   :  { %1450 = vmatprep.subr.bf16.mxu0 %v1746_v0 }
 0x199   :  { %1452 = vmatpush3.bf16.msra.mxu0 %v1451_v56  ;;  %v1505_v56 = vpack.c.bf16 %v271_v55, %v270_v54 }
 0x19a   :  { %1453 = vmatprep.subr.bf16.mxu0 %v1746_v0 }
 0x19d   :  { %1455 = vmatpush3.bf16.msra.mxu0 %v1454_v59  ;;  %v1508_v59 = vpack.c.bf16 %v273_v58, %v272_v57 }
 0x19e   :  { %1456 = vmatprep.subr.bf16.mxu0 %v1746_v0 }
 0x1a1   :  { %1458 = vmatpush3.bf16.msra.mxu0 %v1457_v62  ;;  %v922_v62 = vld [vmem:[%s2103_s3] ss:$0 sm:$0xff] }
 0x1a2   :  { %1459 = vmatprep.subr.bf16.mxu0 %v1746_v0  ;;  %v256_v2 = vadd.f32 %v922_v62, %v2037_v40 }
 0x1a5   :  { %1461 = vmatpush3.bf16.msra.mxu0 %v1460_v3  ;;  %v259_v3 = vmax.f32 %v256_v2, 0.0 }
 0x1a6   :  { %1462 = vmatprep.subr.bf16.mxu0 %v1746_v0 }
 0x1a9   :  { %1464 = vmatpush3.bf16.msra.mxu0 %v1463_v11 }
 0x1aa   :  { %1489 = vmatprep.subr.bf16.mxu0 %v1746_v0 }
 0x25f   :  { %v460_v5 = vpop.f32.mrb[2].mxu0 }
 0x260   :  { %v461_v6 = vadd.f32 %v924_v4, %v460_v5  ;;  %v1169_v7 = vpop.f32.mrb[3].mxu0  ;;  %v667_v4 = vld [vmem:[#allocation12 + $0x70] sm:$0xff]  ;;  %v668_v5 = vld [vmem:[#allocation12 + $0x78] sm:$0xff] }
 0x261   :  { %v926_v7 = vld [vmem:[%s2111_s11] ss:$0 sm:$0xff] }
 0x262   :  { %v464_v8 = vmax.f32 %v461_v6, 0.0  ;;  %v1487_v6 = vpack.c.bf16 %v668_v5, %v667_v4 }
 0x264   :  { %1203 = vmatmul.mubr.f32.vlgmr.msra.gmra.mrb[2].mxu1 %v464_v8  ;;  %v818_v8 = vld [vmem:[#allocation13] sm:$0xff] }
 0x265   :  { %1272 = vmatprep.mubr.msk.f32.mxu1 %vm1747_vm0, %v1748_v1  ;;  %1467 = vmatpush3.bf16.msra.mxu1 %v1466_v15  ;;  %v1514_v12 = vpack.c.bf16 %v819_v9, %v818_v8  ;;  %v821_v15 = vld [vmem:[#allocation13 + $0x18] sm:$0xff] }
 0x266   :  { %1468 = vmatprep.subr.bf16.mxu1 %v1746_v0  ;;  %v1517_v16 = vpack.c.bf16 %v821_v15, %v820_v14 }
 0x269   :  { %1470 = vmatpush3.bf16.msra.mxu1 %v1469_v17  ;;  %v822_v17 = vld [vmem:[#allocation13 + $0x20] sm:$0xff] }
 0x26a   :  { %1471 = vmatprep.subr.bf16.mxu1 %v1746_v0  ;;  %v1520_v19 = vpack.c.bf16 %v823_v18, %v822_v17 }
 0x26d   :  { %1473 = vmatpush3.bf16.msra.mxu1 %v1472_v20  ;;  %v824_v20 = vld [vmem:[#allocation13 + $0x30] sm:$0xff] }
 0x26e   :  { %1474 = vmatprep.subr.bf16.mxu1 %v1746_v0  ;;  %v1523_v22 = vpack.c.bf16 %v825_v21, %v824_v20 }
 0x271   :  { %1476 = vmatpush3.bf16.msra.mxu1 %v1475_v23  ;;  %v826_v23 = vld [vmem:[#allocation13 + $0x40] sm:$0xff] }
 0x272   :  { %1477 = vmatprep.subr.bf16.mxu1 %v1746_v0  ;;  %v1526_v25 = vpack.c.bf16 %v827_v24, %v826_v23 }
 0x275   :  { %1479 = vmatpush3.bf16.msra.mxu1 %v1478_v26  ;;  %v829_v26 = vld [vmem:[#allocation13 + $0x58] sm:$0xff] }
 0x276   :  { %1480 = vmatprep.subr.bf16.mxu1 %v1746_v0 }
 0x279   :  { %1482 = vmatpush3.bf16.msra.mxu1 %v1481_v29 }
 0x27a   :  { %1483 = vmatprep.subr.bf16.mxu1 %v1746_v0 }
 0x27d   :  { %1485 = vmatpush3.bf16.msra.mxu1 %v1484_v32  ;;  %v1532_v32 = vpack.c.bf16 %v831_v31, %v830_v30 }
 0x27e   :  { %1486 = vmatprep.subr.bf16.mxu1 %v1746_v0 }
 0x281   :  { %1488 = vmatpush3.bf16.msra.mxu1 %v1487_v6 }
 0x282   :  { %1513 = vmatprep.subr.bf16.mxu1 %v1746_v0 }
 0x337   :  { %v554_v36 = vpop.f32.mrb[2].mxu1 }
 0x338   :  { %v555_v37 = vadd.f32 %v925_v33, %v554_v36  ;;  %v1204_v38 = vpop.f32.mrb[3].mxu1  ;;  %v832_v33 = vld [vmem:[#allocation13 + $0x70] sm:$0xff] }
 0x339   :  { %v1535_v35 = vpack.c.bf16 %v833_v34, %v832_v33 }
 0x33a   :  { %v558_v41 = vmax.f32 %v555_v37, 0.0  ;;  %v927_v37 = vld [vmem:[%s2114_s14] ss:$0 sm:$0xff] }
 0x33c   :  { %1238 = vmatmul.mubr.f32.vlgmr.msra.gmra.mrb[4].mxu0 %v558_v41 }
 0x33d   :  { %1491 = vmatpush3.bf16.msra.mxu0 %v1490_v39  ;;  %1307 = vmatprep.mubr.msk.f32.mxu0 %vm1747_vm0, %v1748_v1 }
 0x33e   :  { %1492 = vmatprep.subr.bf16.mxu0 %v1746_v0 }
 0x341   :  { %1494 = vmatpush3.bf16.msra.mxu0 %v1493_v44 }
 0x342   :  { %1495 = vmatprep.subr.bf16.mxu0 %v1746_v0 }
 0x345   :  { %1497 = vmatpush3.bf16.msra.mxu0 %v1496_v47 }
 0x346   :  { %1498 = vmatprep.subr.bf16.mxu0 %v1746_v0 }
 0x349   :  { %1500 = vmatpush3.bf16.msra.mxu0 %v1499_v50 }
 0x34a   :  { %1501 = vmatprep.subr.bf16.mxu0 %v1746_v0 }
 0x34d   :  { %1503 = vmatpush3.bf16.msra.mxu0 %v1502_v53 }
 0x34e   :  { %1504 = vmatprep.subr.bf16.mxu0 %v1746_v0 }
 0x351   :  { %1506 = vmatpush3.bf16.msra.mxu0 %v1505_v56 }
 0x352   :  { %1507 = vmatprep.subr.bf16.mxu0 %v1746_v0 }
 0x355   :  { %1509 = vmatpush3.bf16.msra.mxu0 %v1508_v59 }
 0x356   :  { %1510 = vmatprep.subr.bf16.mxu0 %v1746_v0 }
 0x359   :  { %1512 = vmatpush3.bf16.msra.mxu0 %v1511_v63 }
 0x35c   :  { %1308 = vmatmul.mubr.f32.vlgmr.msra.gmra.mrb[6].mxu0 %v259_v3 }
 0x40f   :  { %v648_v10 = vpop.f32.mrb[4].mxu0 }
 0x410   :  { %v649_v11 = vadd.f32 %v926_v7, %v648_v10  ;;  %v1239_v40 = vpop.f32.mrb[5].mxu0 }
 0x412   :  { %v652_v13 = vmax.f32 %v649_v11, 0.0 }
 0x414   :  { %1273 = vmatmul.mubr.f32.vlgmr.msra.gmra.mrb[4].mxu1 %v652_v13 }
 0x415   :  { %1515 = vmatpush3.bf16.msra.mxu1 %v1514_v12  ;;  %1342 = vmatprep.mubr.msk.f32.mxu1 %vm1747_vm0, %v1748_v1  ;;  %v828_v1 = vld [vmem:[#allocation13 + $0x50] sm:$0xff] }
 0x416   :  { %1516 = vmatprep.subr.bf16.mxu1 %v1746_v0  ;;  %v1529_v27 = vpack.c.bf16 %v829_v26, %v828_v1 }
 0x419   :  { %1518 = vmatpush3.bf16.msra.mxu1 %v1517_v16 }
 0x41a   :  { %1519 = vmatprep.subr.bf16.mxu1 %v1746_v0 }
 0x41d   :  { %1521 = vmatpush3.bf16.msra.mxu1 %v1520_v19 }
 0x41e   :  { %1522 = vmatprep.subr.bf16.mxu1 %v1746_v0 }
 0x421   :  { %1524 = vmatpush3.bf16.msra.mxu1 %v1523_v22 }
 0x422   :  { %1525 = vmatprep.subr.bf16.mxu1 %v1746_v0 }
 0x425   :  { %1527 = vmatpush3.bf16.msra.mxu1 %v1526_v25 }
 0x426   :  { %1528 = vmatprep.subr.bf16.mxu1 %v1746_v0 }
 0x429   :  { %1530 = vmatpush3.bf16.msra.mxu1 %v1529_v27 }
 0x42a   :  { %1531 = vmatprep.subr.bf16.mxu1 %v1746_v0 }
 0x42d   :  { %1533 = vmatpush3.bf16.msra.mxu1 %v1532_v32 }
 0x42e   :  { %1534 = vmatprep.subr.bf16.mxu1 %v1746_v0 }
 0x42f   :  { %v805_v28 = vpop.f32.mrb[6].mxu0 }
 0x430   :  { %v1309_v29 = vpop.f32.mrb[7].mxu0 }
 0x431   :  { %1536 = vmatpush3.bf16.msra.mxu1 %v1535_v35 }
 0x4e7   :  { %v735_v36 = vpop.f32.mrb[4].mxu1 }
 0x4e8   :  { %v806_v38 = vadd.f32 %v805_v28, %v735_v36  ;;  %v1274_v39 = vpop.f32.mrb[5].mxu1 }
 0x4ea   :  { %v816_v41 = vadd.f32 %v927_v37, %v806_v38 }
 0x4ec   :  { %v817_v42 = vmax.f32 %v816_v41, 0.0 }
 0x4ee   :  { %1343 = vmatmul.mubr.f32.vlgmr.msra.gmra.mrb[6].mxu1 %v817_v42 }
 0x5c1   :  { %v907_v44 = vpop.f32.mrb[6].mxu1 }
 0x5c2   :  { %v908_v0 = vadd.f32 %v928_v43, %v907_v44  ;;  %v1344_v45 = vpop.f32.mrb[7].mxu1 }
 0x5c4   :  { %v911_v46 = vmax.f32 %v908_v0, 0.0 }
 0x5c6   :  { %912 = vst [vmem:[%s2117_s17] sm:$0xff] %v911_v46 }
 0x5c7   :  { %917 = vsyncpa [#allocation3], 1 }
 0x5c8   :  { %918 = vsyncpa [#allocation5], 1 }
 0x5c9   :  { %919 = vsyncpa [#allocation8], 1 }
 0x5ca   :  { %920 = vsyncpa [#allocation11], 1 }
 0x5cb   :  { %921 = vsyncpa [#allocation14], 1 }

</bundles_post_ra>
